<compile_context>
chip_gen: v6e
topology: v6e:2x2x1
jax: 0.10.0
libtpu: 0.0.40
codegen_flags: <defaults>
</compile_context>

<pallas_src>
import jax
import jax.numpy as jnp
from jax.experimental import pallas as pl
from jax.experimental.pallas import tpu as pltpu

input_size = 30
hidden_size = 500
num_classes = 2
NEG_SLOPE = 0.02

_TB_SINGLE_MAX = 1024  # below this, run the whole batch in one grid step
_TB_TILE = 512         # batch tile for large batches


def _round_up(n, m):
    return ((n + m - 1) // m) * m


def _mlp_kernel(x_ref, w1_ref, b1_ref, w2_ref, b2_ref, o_ref):
    # fc1: (TB, in) @ (in, H_pad) + (1, H_pad)      -- MXU, f32 accumulate
    h = jnp.dot(x_ref[...], w1_ref[...], preferred_element_type=jnp.float32)
    h = h + b1_ref[...]
    # LeakyReLU(negative_slope=0.02)                -- VPU
    h = jnp.where(h >= 0, h, NEG_SLOPE * h)
    # fc2: (TB, H_pad) @ (H_pad, C_pad) + (1, C_pad) -- MXU, lane-dense store
    out = jnp.dot(h, w2_ref[...], preferred_element_type=jnp.float32)
    o_ref[...] = (out + b2_ref[...]).astype(o_ref.dtype)


@jax.jit
def neural_net_forward(x, w1, b1, w2, b2):
    """Forward pass of NeuralNet. x: (B, 30); returns (B, 2) float32."""
    B, in_f = x.shape
    hidden = w1.shape[1]
    classes = w2.shape[1]

    # Padded problem dims (zero padding => numerically exact).
    H_pad = _round_up(hidden, 128)              # 500 -> 512
    C_pad = _round_up(max(classes, 128), 128)   # 2   -> 128 (lane-dense output)

    # Batch tile: single step for small/medium batches, 512-row tiles otherwise.
    if B <= _TB_SINGLE_MAX:
        TB = _round_up(B, 8)
        B_pad = TB
    else:
        TB = _TB_TILE
        B_pad = _round_up(B, TB)

    x_p = jnp.pad(x.astype(jnp.float32), ((0, B_pad - B), (0, 0)))
    w1_p = jnp.pad(w1, ((0, 0), (0, H_pad - hidden)))
    b1_p = jnp.pad(b1, ((0, H_pad - hidden),)).reshape(1, H_pad)
    w2_p = jnp.pad(w2, ((0, H_pad - hidden), (0, C_pad - classes)))
    b2_p = jnp.pad(b2, ((0, C_pad - classes),)).reshape(1, C_pad)

    grid = (B_pad // TB,)

    flops = 2 * B_pad * in_f * H_pad + 2 * B_pad * H_pad * C_pad
    bytes_accessed = 4 * (
        B_pad * in_f            # x
        + in_f * H_pad          # w1
        + H_pad                 # b1
        + H_pad * C_pad         # w2
        + C_pad                 # b2
        + B_pad * C_pad         # out
    )

    out_padded = pl.pallas_call(
        _mlp_kernel,
        out_shape=jax.ShapeDtypeStruct((B_pad, C_pad), jnp.float32),
        grid=grid,
        in_specs=[
            # Activations: tiled along batch.
            pl.BlockSpec((TB, in_f), lambda i: (i, 0)),
            # Weights/biases: same block every step -> stay VMEM-resident.
            pl.BlockSpec((in_f, H_pad), lambda i: (0, 0)),
            pl.BlockSpec((1, H_pad), lambda i: (0, 0)),
            pl.BlockSpec((H_pad, C_pad), lambda i: (0, 0)),
            pl.BlockSpec((1, C_pad), lambda i: (0, 0)),
        ],
        out_specs=pl.BlockSpec((TB, C_pad), lambda i: (i, 0)),
        compiler_params=pltpu.CompilerParams(
            dimension_semantics=("parallel",)),
        cost_estimate=pl.CostEstimate(
            flops=flops, transcendentals=0, bytes_accessed=bytes_accessed),
    )(x_p, w1_p, b1_p, w2_p, b2_p)

    # Slice away batch and class padding.
    return out_padded[:B, :classes]


def _init_params(key):
    """Deterministic init mimicking nn.Linear's U(-1/sqrt(fan_in), 1/sqrt(fan_in))."""
    k1, k2, k3, k4 = jax.random.split(key, 4)
    bound1 = 1.0 / jnp.sqrt(float(input_size))
    bound2 = 1.0 / jnp.sqrt(float(hidden_size))
    w1 = jax.random.uniform(k1, (input_size, hidden_size), jnp.float32,
                            minval=-bound1, maxval=bound1)
    b1 = jax.random.uniform(k2, (hidden_size,), jnp.float32,
                            minval=-bound1, maxval=bound1)
    w2 = jax.random.uniform(k3, (hidden_size, num_classes), jnp.float32,
                            minval=-bound2, maxval=bound2)
    b2 = jax.random.uniform(k4, (num_classes,), jnp.float32,
                            minval=-bound2, maxval=bound2)
    return w1, b1, w2, b2


def _reference(x, w1, b1, w2, b2):
    h = x @ w1 + b1
    h = jnp.where(h >= 0, h, NEG_SLOPE * h)
    return h @ w2 + b2


if __name__ == "__main__":
    key = jax.random.PRNGKey(0)
    k_params, k_x1, k_x2 = jax.random.split(key, 3)
    w1, b1, w2, b2 = _init_params(k_params)

    # Small batch (single grid step, exercises batch/class padding).
    x_small = jax.random.normal(k_x1, (8, input_size), jnp.float32)
    out_small = jax.block_until_ready(neural_net_forward(x_small, w1, b1, w2, b2))
    ref_small = _reference(x_small, w1, b1, w2, b2)
    assert out_small.shape == (8, num_classes)
    assert jnp.allclose(out_small, ref_small, atol=1e-4, rtol=1e-4)

    # Larger, non-multiple-of-8 batch (exercises batch padding / second compile).
    x_big = jax.random.normal(k_x2, (600, input_size), jnp.float32)
    out_big = jax.block_until_ready(neural_net_forward(x_big, w1, b1, w2, b2))
    ref_big = _reference(x_big, w1, b1, w2, b2)
    assert out_big.shape == (600, num_classes)
    assert jnp.allclose(out_big, ref_big, atol=1e-4, rtol=1e-4)

    print("KERNEL_OK")
</pallas_src>

<mosaic_0001>
module attributes {stable_mosaic.version = 11 : i64} {
  func.func @_mlp_kernel(%arg0: i32, %arg1: memref<8x30xf32, #tpu.memory_space<vmem>>, %arg2: memref<30x512xf32, #tpu.memory_space<vmem>>, %arg3: memref<1x512xf32, #tpu.memory_space<vmem>>, %arg4: memref<512x128xf32, #tpu.memory_space<vmem>>, %arg5: memref<1x128xf32, #tpu.memory_space<vmem>>, %arg6: memref<8x128xf32, #tpu.memory_space<vmem>>) attributes {dimension_semantics = [#tpu.dimension_semantics<parallel>], iteration_bounds = array<i64: 1>, scalar_prefetch = 0 : i64, scratch_operands = 0 : i64, tpu.core_type = #tpu.core_type<tc>, window_params = [{transform_indices = @transform_0, window_bounds = array<i64: 8, 30>}, {pipeline_mode = #tpu.pipeline_mode<synchronous>, transform_indices = @transform_1, window_bounds = array<i64: 30, 512>}, {pipeline_mode = #tpu.pipeline_mode<synchronous>, transform_indices = @transform_2, window_bounds = array<i64: 1, 512>}, {pipeline_mode = #tpu.pipeline_mode<synchronous>, transform_indices = @transform_3, window_bounds = array<i64: 512, 128>}, {pipeline_mode = #tpu.pipeline_mode<synchronous>, transform_indices = @transform_4, window_bounds = array<i64: 1, 128>}, {transform_indices = @transform_5, window_bounds = array<i64: 8, 128>}]} {
    %c0 = arith.constant 0 : index
    %c0_0 = arith.constant 0 : index
    %0 = vector.load %arg1[%c0, %c0_0] : memref<8x30xf32, #tpu.memory_space<vmem>>, vector<8x30xf32>
    %c0_1 = arith.constant 0 : index
    %c0_2 = arith.constant 0 : index
    %1 = vector.load %arg2[%c0_1, %c0_2] : memref<30x512xf32, #tpu.memory_space<vmem>>, vector<30x512xf32>
    %cst = arith.constant dense<0.000000e+00> : vector<8x512xf32>
    %2 = tpu.matmul %0, %1, %cst {dimension_numbers = #tpu.dot_dimension_numbers<[1], [0], [0], [1], [0, 0, 1, 1], [], []>} : vector<8x30xf32>, vector<30x512xf32>, vector<8x512xf32> -> vector<8x512xf32>
    %c0_3 = arith.constant 0 : index
    %c0_4 = arith.constant 0 : index
    %3 = vector.load %arg3[%c0_3, %c0_4] : memref<1x512xf32, #tpu.memory_space<vmem>>, vector<1x512xf32>
    %4 = vector.broadcast %3 : vector<1x512xf32> to vector<8x512xf32>
    %5 = arith.addf %2, %4 : vector<8x512xf32>
    %cst_5 = arith.constant 0.000000e+00 : f32
    %6 = vector.broadcast %cst_5 : f32 to vector<8x512xf32>
    %7 = arith.cmpf oge, %5, %6 : vector<8x512xf32>
    %cst_6 = arith.constant 2.000000e-02 : f32
    %8 = vector.broadcast %cst_6 : f32 to vector<8x512xf32>
    %9 = arith.mulf %8, %5 : vector<8x512xf32>
    %10 = arith.select %7, %5, %9 : vector<8x512xi1>, vector<8x512xf32>
    %c0_7 = arith.constant 0 : index
    %c0_8 = arith.constant 0 : index
    %11 = vector.load %arg4[%c0_7, %c0_8] : memref<512x128xf32, #tpu.memory_space<vmem>>, vector<512x128xf32>
    %cst_9 = arith.constant dense<0.000000e+00> : vector<8x128xf32>
    %12 = tpu.matmul %10, %11, %cst_9 {dimension_numbers = #tpu.dot_dimension_numbers<[1], [0], [0], [1], [0, 0, 1, 1], [], []>} : vector<8x512xf32>, vector<512x128xf32>, vector<8x128xf32> -> vector<8x128xf32>
    %c0_10 = arith.constant 0 : index
    %c0_11 = arith.constant 0 : index
    %13 = vector.load %arg5[%c0_10, %c0_11] : memref<1x128xf32, #tpu.memory_space<vmem>>, vector<1x128xf32>
    %14 = vector.broadcast %13 : vector<1x128xf32> to vector<8x128xf32>
    %15 = arith.addf %12, %14 : vector<8x128xf32>
    %c0_12 = arith.constant 0 : index
    %c0_13 = arith.constant 0 : index
    %16 = vector.load %arg6[%c0_12, %c0_13] : memref<8x128xf32, #tpu.memory_space<vmem>>, vector<8x128xf32>
    tpu.vector_store %arg6[%c0_12, %c0_13], %15 {strides = array<i32>} : memref<8x128xf32, #tpu.memory_space<vmem>>, vector<8x128xf32>,
    return
  }
  func.func @transform_0(%arg0: i32) -> (i32, i32) {
    %c0_i32 = arith.constant 0 : i32
    %c0_i32_0 = arith.constant 0 : i32
    return %arg0, %c0_i32 : i32, i32
  }
  func.func @transform_1(%arg0: i32) -> (i32, i32) {
    %c0_i32 = arith.constant 0 : i32
    %c0_i32_0 = arith.constant 0 : i32
    %c0_i32_1 = arith.constant 0 : i32
    return %c0_i32, %c0_i32_0 : i32, i32
  }
  func.func @transform_2(%arg0: i32) -> (i32, i32) {
    %c0_i32 = arith.constant 0 : i32
    %c0_i32_0 = arith.constant 0 : i32
    %c0_i32_1 = arith.constant 0 : i32
    return %c0_i32, %c0_i32_0 : i32, i32
  }
  func.func @transform_3(%arg0: i32) -> (i32, i32) {
    %c0_i32 = arith.constant 0 : i32
    %c0_i32_0 = arith.constant 0 : i32
    %c0_i32_1 = arith.constant 0 : i32
    return %c0_i32, %c0_i32_0 : i32, i32
  }
  func.func @transform_4(%arg0: i32) -> (i32, i32) {
    %c0_i32 = arith.constant 0 : i32
    %c0_i32_0 = arith.constant 0 : i32
    %c0_i32_1 = arith.constant 0 : i32
    return %c0_i32, %c0_i32_0 : i32, i32
  }
  func.func @transform_5(%arg0: i32) -> (i32, i32) {
    %c0_i32 = arith.constant 0 : i32
    %c0_i32_0 = arith.constant 0 : i32
    return %arg0, %c0_i32 : i32, i32
  }
}

</mosaic_0001>

<bundles_post_ra>
// kernel: neural_net_forward.1
= control target key start
LH: loop header
LB: loop body
LE: loop exit
PB: predicated region body
PF: predicated region fallthrough
CT: control target
= control target key end

     0   :  { %vm63_vm0 = vcmask 1045504   ;;  %v524_v3 = vmov 0.0   ;;  %vm59_vm1 = vcmask 244736   ;;  %s807_s1 = inlined_call_operand.vmem [shape: f32[30,512], index: 1, kind: input, shape index: {}]   ;;  %s808_s0 = inlined_call_operand.vmem [shape: f32[8,30], index: 0, kind: input, shape index: {}]   ;;  %s809_s3 = inlined_call_operand.vmem [shape: f32[512,128], index: 3, kind: input, shape index: {}]   ;;  %s810_s2 = inlined_call_operand.vmem [shape: f32[1,512], index: 2, kind: input, shape index: {}]   ;;  %s811_s4 = inlined_call_operand.vmem [shape: f32[1,128], index: 4, kind: input, shape index: {}]   ;;  %s812_s5 = inlined_call_operand.vmem [shape: f32[8,128], index: 5, kind: output, shape index: {}]  }
   0x1   :  { %v34_v0 = vld [vmem:[%s807_s1 + $0x68] sm:$0x3f]  ;;  %v36_v1 = vld [vmem:[%s807_s1 + $0x78] sm:$0x3f]  ;;  %v33_v2 = vld [vmem:[%s807_s1 + $0x60] sm:$0x3f]  ;;  %140 = vmatprep.mubr.f32.mxu0 %v524_v3  ;;  %211 = vmatprep.mubr.f32.mxu1 %v524_v3 }
   0x2   :  { %446 = vmatprep.subr.msk.mxu0 %vm63_vm0, %v34_v0  ;;  %449 = vmatprep.subr.msk.mxu1 %vm63_vm0, %v36_v1  ;;  %v35_v4 = vld [vmem:[%s807_s1 + $0x70] sm:$0x3f]  ;;  %v30_v5 = vld [vmem:[%s807_s1 + $0x48] sm:$0xff]  ;;  %v32_v6 = vld [vmem:[%s807_s1 + $0x58] sm:$0xff] }
   0x3   :  { %447 = vmatpush1.msk.msra.mxu0 %vm63_vm0, %v33_v2  ;;  %450 = vmatpush1.msk.msra.mxu1 %vm63_vm0, %v35_v4  ;;  %v29_v7 = vld [vmem:[%s807_s1 + $0x40] sm:$0xff]  ;;  %v31_v8 = vld [vmem:[%s807_s1 + $0x50] sm:$0xff]  ;;  %v26_v9 = vld [vmem:[%s807_s1 + $0x28] sm:$0xff] }
   0x4   :  { %102 = vmatprep.subr.mxu0 %v30_v5  ;;  %173 = vmatprep.subr.mxu1 %v32_v6  ;;  %v28_v10 = vld [vmem:[%s807_s1 + $0x38] sm:$0xff]  ;;  %v25_v11 = vld [vmem:[%s807_s1 + $0x20] sm:$0xff]  ;;  %v27_v12 = vld [vmem:[%s807_s1 + $0x30] sm:$0xff] }
   0x5   :  { %103 = vmatpush1.msra.mxu0 %v29_v7  ;;  %174 = vmatpush1.msra.mxu1 %v31_v8  ;;  %v22_v13 = vld [vmem:[%s807_s1 + $0x8] sm:$0xff]  ;;  %v24_v14 = vld [vmem:[%s807_s1 + $0x18] sm:$0xff]  ;;  %v21_v15 = vld [vmem:[%s807_s1] sm:$0xff] }
   0x6   :  { %104 = vmatprep.subr.mxu0 %v26_v9  ;;  %175 = vmatprep.subr.mxu1 %v28_v10  ;;  %v23_v16 = vld [vmem:[%s807_s1 + $0x10] sm:$0xff]  ;;  %v20_v17 = vld [vmem:[%s808_s0] sm:$0xff]  ;;  %v261_v18 = vld [vmem:[%s809_s3 + $0xf8] sm:$0xff] }
   0x7   :  { %105 = vmatpush1.msra.mxu0 %v25_v11  ;;  %176 = vmatpush1.msra.mxu1 %v27_v12  ;;  %v293_v19 = vld [vmem:[%s809_s3 + $0x1f8] sm:$0xff]  ;;  %v260_v22 = vld [vmem:[%s809_s3 + $0xf0] sm:$0xff]  ;;  %v259_v26 = vld [vmem:[%s809_s3 + $0xe8] sm:$0xff] }
   0x8   :  { %106 = vmatprep.subr.mxu0 %v22_v13  ;;  %177 = vmatprep.subr.mxu1 %v24_v14  ;;  %v245_v20 = vld [vmem:[%s809_s3 + $0x78] sm:$0xff]  ;;  %v292_v23 = vld [vmem:[%s809_s3 + $0x1f0] sm:$0xff]  ;;  %v291_v27 = vld [vmem:[%s809_s3 + $0x1e8] sm:$0xff] }
   0x9   :  { %107 = vmatpush1.msra.mxu0 %v21_v15  ;;  %178 = vmatpush1.msra.mxu1 %v23_v16  ;;  %v277_v21 = vld [vmem:[%s809_s3 + $0x178] sm:$0xff]  ;;  %v244_v24 = vld [vmem:[%s809_s3 + $0x70] sm:$0xff]  ;;  %v243_v28 = vld [vmem:[%s809_s3 + $0x68] sm:$0xff] }
   0xa   :  { %448 = vmatmul.mubr.msk.f32.vlgmr.msra.gmra.mxu0 %vm59_vm1, %v20_v17  ;;  %451 = vmatmul.mubr.msk.f32.vlgmr.msra.gmra.mxu1 %vm59_vm1, %v20_v17  ;;  %v276_v25 = vld [vmem:[%s809_s3 + $0x170] sm:$0xff]  ;;  %v275_v29 = vld [vmem:[%s809_s3 + $0x168] sm:$0xff]  ;;  %v258_v30 = vld [vmem:[%s809_s3 + $0xe0] sm:$0xff] }
   0xb   :  { %453 = vmatprep.subr.mxu0 %v261_v18  ;;  %488 = vmatprep.subr.mxu1 %v293_v19  ;;  %v290_v31 = vld [vmem:[%s809_s3 + $0x1e0] sm:$0xff]  ;;  %v257_v34 = vld [vmem:[%s809_s3 + $0xd8] sm:$0xff]  ;;  %v256_v38 = vld [vmem:[%s809_s3 + $0xd0] sm:$0xff]  ;;  %v39_v18 = vlaneseq }
   0xc   :  { %454 = vmatpush3.msra.mxu0 %v245_v20  ;;  %489 = vmatpush3.msra.mxu1 %v277_v21  ;;  %v242_v32 = vld [vmem:[%s809_s3 + $0x60] sm:$0xff]  ;;  %v289_v35 = vld [vmem:[%s809_s3 + $0x1d8] sm:$0xff]  ;;  %v288_v39 = vld [vmem:[%s809_s3 + $0x1d0] sm:$0xff] }
   0xd   :  { %455 = vmatprep.subr.mxu0 %v260_v22  ;;  %490 = vmatprep.subr.mxu1 %v292_v23  ;;  %v274_v33 = vld [vmem:[%s809_s3 + $0x160] sm:$0xff]  ;;  %v241_v36 = vld [vmem:[%s809_s3 + $0x58] sm:$0xff]  ;;  %v240_v40 = vld [vmem:[%s809_s3 + $0x50] sm:$0xff]  ;;  %v40_v19 = vshrl.u32 %v39_v18, 7 }
   0xe   :  { %456 = vmatpush3.msra.mxu0 %v244_v24  ;;  %491 = vmatpush3.msra.mxu1 %v276_v25  ;;  %v273_v37 = vld [vmem:[%s809_s3 + $0x158] sm:$0xff]  ;;  %v272_v41 = vld [vmem:[%s809_s3 + $0x150] sm:$0xff]  ;;  %v255_v42 = vld [vmem:[%s809_s3 + $0xc8] sm:$0xff] }
   0xf   :  { %457 = vmatprep.subr.mxu0 %v259_v26  ;;  %492 = vmatprep.subr.mxu1 %v291_v27  ;;  %v287_v43 = vld [vmem:[%s809_s3 + $0x1c8] sm:$0xff]  ;;  %v254_v46 = vld [vmem:[%s809_s3 + $0xc0] sm:$0xff]  ;;  %v253_v50 = vld [vmem:[%s809_s3 + $0xb8] sm:$0xff]  ;;  %v41_v20 = vsub.s32 0, %v40_v19  ;;  %v49_v21 = vsub.s32 2, %v40_v19  ;;  %v45_v23 = vsub.s32 1, %v40_v19 }
  0x10   :  { %458 = vmatpush3.msra.mxu0 %v243_v28  ;;  %493 = vmatpush3.msra.mxu1 %v275_v29  ;;  %v239_v44 = vld [vmem:[%s809_s3 + $0x48] sm:$0xff]  ;;  %v286_v47 = vld [vmem:[%s809_s3 + $0x1c0] sm:$0xff]  ;;  %v285_v51 = vld [vmem:[%s809_s3 + $0x1b8] sm:$0xff]  ;;  %v53_v24 = vsub.s32 3, %v40_v19 }
  0x11   :  { %459 = vmatprep.subr.mxu0 %v258_v30  ;;  %494 = vmatprep.subr.mxu1 %v290_v31  ;;  %v271_v45 = vld [vmem:[%s809_s3 + $0x148] sm:$0xff]  ;;  %v238_v48 = vld [vmem:[%s809_s3 + $0x40] sm:$0xff]  ;;  %v237_v52 = vld [vmem:[%s809_s3 + $0x38] sm:$0xff] }
  0x12   :  { %460 = vmatpush3.msra.mxu0 %v242_v32  ;;  %495 = vmatpush3.msra.mxu1 %v274_v33  ;;  %v270_v49 = vld [vmem:[%s809_s3 + $0x140] sm:$0xff]  ;;  %v269_v53 = vld [vmem:[%s809_s3 + $0x138] sm:$0xff]  ;;  %v252_v54 = vld [vmem:[%s809_s3 + $0xb0] sm:$0xff] }
  0x13   :  { %461 = vmatprep.subr.mxu0 %v257_v34  ;;  %496 = vmatprep.subr.mxu1 %v289_v35  ;;  %v284_v55 = vld [vmem:[%s809_s3 + $0x1b0] sm:$0xff]  ;;  %v251_v58 = vld [vmem:[%s809_s3 + $0xa8] sm:$0xff]  ;;  %v250_v62 = vld [vmem:[%s809_s3 + $0xa0] sm:$0xff] }
  0x14   :  { %462 = vmatpush3.msra.mxu0 %v241_v36  ;;  %497 = vmatpush3.msra.mxu1 %v273_v37  ;;  %v236_v56 = vld [vmem:[%s809_s3 + $0x30] sm:$0xff]  ;;  %v283_v59 = vld [vmem:[%s809_s3 + $0x1a8] sm:$0xff]  ;;  %v282_v63 = vld [vmem:[%s809_s3 + $0x1a0] sm:$0xff] }
  0x15   :  { %463 = vmatprep.subr.mxu0 %v256_v38  ;;  %498 = vmatprep.subr.mxu1 %v288_v39  ;;  %v268_v57 = vld [vmem:[%s809_s3 + $0x130] sm:$0xff]  ;;  %v235_v60 = vld [vmem:[%s809_s3 + $0x28] sm:$0xff]  ;;  %v234_v0 = vld [vmem:[%s809_s3 + $0x20] sm:$0xff] }
  0x16   :  { %464 = vmatpush3.msra.mxu0 %v240_v40  ;;  %499 = vmatpush3.msra.mxu1 %v272_v41  ;;  %v267_v61 = vld [vmem:[%s809_s3 + $0x128] sm:$0xff]  ;;  %v266_v1 = vld [vmem:[%s809_s3 + $0x120] sm:$0xff]  ;;  %v249_v2 = vld [vmem:[%s809_s3 + $0x98] sm:$0xff] }
  0x17   :  { %465 = vmatprep.subr.mxu0 %v255_v42  ;;  %500 = vmatprep.subr.mxu1 %v287_v43  ;;  %v281_v3 = vld [vmem:[%s809_s3 + $0x198] sm:$0xff]  ;;  %v248_v6 = vld [vmem:[%s809_s3 + $0x90] sm:$0xff]  ;;  %v247_v10 = vld [vmem:[%s809_s3 + $0x88] sm:$0xff] }
  0x18   :  { %466 = vmatpush3.msra.mxu0 %v239_v44  ;;  %501 = vmatpush3.msra.mxu1 %v271_v45  ;;  %v233_v4 = vld [vmem:[%s809_s3 + $0x18] sm:$0xff]  ;;  %v280_v7 = vld [vmem:[%s809_s3 + $0x190] sm:$0xff]  ;;  %v279_v11 = vld [vmem:[%s809_s3 + $0x188] sm:$0xff] }
  0x19   :  { %467 = vmatprep.subr.mxu0 %v254_v46  ;;  %502 = vmatprep.subr.mxu1 %v286_v47  ;;  %v265_v5 = vld [vmem:[%s809_s3 + $0x118] sm:$0xff]  ;;  %v232_v8 = vld [vmem:[%s809_s3 + $0x10] sm:$0xff]  ;;  %v231_v12 = vld [vmem:[%s809_s3 + $0x8] sm:$0xff] }
  0x1a   :  { %468 = vmatpush3.msra.mxu0 %v238_v48  ;;  %503 = vmatpush3.msra.mxu1 %v270_v49  ;;  %v264_v9 = vld [vmem:[%s809_s3 + $0x110] sm:$0xff]  ;;  %v263_v13 = vld [vmem:[%s809_s3 + $0x108] sm:$0xff]  ;;  %v246_v14 = vld [vmem:[%s809_s3 + $0x80] sm:$0xff] }
  0x1b   :  { %469 = vmatprep.subr.mxu0 %v253_v50  ;;  %504 = vmatprep.subr.mxu1 %v285_v51  ;;  %v278_v15 = vld [vmem:[%s809_s3 + $0x180] sm:$0xff] }
  0x1c   :  { %470 = vmatpush3.msra.mxu0 %v237_v52  ;;  %505 = vmatpush3.msra.mxu1 %v269_v53  ;;  %v230_v16 = vld [vmem:[%s809_s3] sm:$0xff] }
  0x1d   :  { %471 = vmatprep.subr.mxu0 %v252_v54  ;;  %506 = vmatprep.subr.mxu1 %v284_v55  ;;  %v262_v17 = vld [vmem:[%s809_s3 + $0x100] sm:$0xff] }
  0x1e   :  { %472 = vmatpush3.msra.mxu0 %v236_v56  ;;  %507 = vmatpush3.msra.mxu1 %v268_v57  ;;  %v37_v22 = vld [vmem:[%s810_s2] sm:$0xf] }
  0x1f   :  { %473 = vmatprep.subr.mxu0 %v251_v58  ;;  %508 = vmatprep.subr.mxu1 %v283_v59  ;;  %v42_v25 = vrot.slane %v37_v22, %v41_v20  ;;  %v50_v26 = vrot.slane %v37_v22, %v49_v21  ;;  %v46_v29 = vrot.slane %v37_v22, %v45_v23  ;;  %v452_v47 = vld [vmem:[%s811_s4] ss:$0 sm:$0xff] }
  0x20   :  { %474 = vmatpush3.msra.mxu0 %v235_v60  ;;  %509 = vmatpush3.msra.mxu1 %v267_v61  ;;  %v54_v30 = vrot.slane %v37_v22, %v53_v24 }
  0x21   :  { %475 = vmatprep.subr.mxu0 %v250_v62  ;;  %510 = vmatprep.subr.mxu1 %v282_v63 }
  0x22   :  { %476 = vmatpush3.msra.mxu0 %v234_v0  ;;  %511 = vmatpush3.msra.mxu1 %v266_v1 }
  0x23   :  { %477 = vmatprep.subr.mxu0 %v249_v2  ;;  %512 = vmatprep.subr.mxu1 %v281_v3 }
  0x24   :  { %478 = vmatpush3.msra.mxu0 %v233_v4  ;;  %513 = vmatpush3.msra.mxu1 %v265_v5 }
  0x25   :  { %479 = vmatprep.subr.mxu0 %v248_v6  ;;  %514 = vmatprep.subr.mxu1 %v280_v7 }
  0x26   :  { %480 = vmatpush3.msra.mxu0 %v232_v8  ;;  %515 = vmatpush3.msra.mxu1 %v264_v9 }
  0x27   :  { %481 = vmatprep.subr.mxu0 %v247_v10  ;;  %516 = vmatprep.subr.mxu1 %v279_v11 }
  0x28   :  { %482 = vmatpush3.msra.mxu0 %v231_v12  ;;  %517 = vmatpush3.msra.mxu1 %v263_v13 }
  0x29   :  { %483 = vmatprep.subr.mxu0 %v246_v14  ;;  %518 = vmatprep.subr.mxu1 %v278_v15 }
  0x2a   :  { %484 = vmatpush3.msra.mxu0 %v230_v16  ;;  %519 = vmatpush3.msra.mxu1 %v262_v17 }
  0xca   :  { %v142_v27 = vpop.f32.mrf.mxu0  ;;  %v213_v28 = vpop.f32.mrf.mxu1 }
  0xcb   :  { %v143_v31 = vadd.f32 %v142_v27, %v42_v25  ;;  %v214_v32 = vadd.f32 %v213_v28, %v50_v26 }
  0xcc   :  { %v144_v33 = vpop.f32.mrf.mxu0  ;;  %v215_v34 = vpop.f32.mrf.mxu1 }
  0xcd   :  { %v145_v35 = vadd.f32 %v144_v33, %v46_v29  ;;  %v216_v36 = vadd.f32 %v215_v34, %v54_v30  ;;  %vm218_vm2 = vcmp.ge.f32.partialorder %v143_v31, 0.0  ;;  %v222_v37 = vmul.f32 0.02, %v143_v31 }
  0xce   :  { %vm220_vm3 = vcmp.ge.f32.partialorder %v214_v32, 0.0  ;;  %v224_v38 = vmul.f32 0.02, %v214_v32 }
  0xcf   :  { %v223_v39 = vmul.f32 0.02, %v145_v35  ;;  %v225_v40 = vmul.f32 0.02, %v216_v36  ;;  %vm219_vm4 = vcmp.ge.f32.partialorder %v145_v35, 0.0  ;;  %vm221_vm5 = vcmp.ge.f32.partialorder %v216_v36, 0.0 }
  0xd0   :  { %v226_v43 = vsel %vm218_vm2, %v143_v31, %v222_v37  ;;  %v228_v44 = vsel %vm220_vm3, %v214_v32, %v224_v38 }
  0xd1   :  { %v227_v41 = vsel %vm219_vm4, %v145_v35, %v223_v39  ;;  %v229_v42 = vsel %vm221_vm5, %v216_v36, %v225_v40 }
  0xd2   :  { %365 = vmatprep.mubr.f32.mxu0 %v227_v41  ;;  %435 = vmatprep.mubr.f32.mxu1 %v229_v42 }
  0xd3   :  { %366 = vmatmul.mubr.f32.vlgmr.msra.gmra.mxu0 %v226_v43  ;;  %436 = vmatmul.mubr.f32.vlgmr.msra.gmra.mxu1 %v228_v44 }
 0x193   :  { %v485_v45 = vpop.f32.mrf.mxu0  ;;  %v520_v46 = vpop.f32.mrf.mxu1 }
 0x195   :  { %v486_v48 = vpop.f32.mrf.mxu0  ;;  %v521_v49 = vpop.f32.mrf.mxu1 }
 0x196   :  { %v487_v50 = vadd.f32 %v486_v48, %v485_v45  ;;  %v522_v52 = vadd.f32 %v521_v49, %v520_v46 }
 0x198   :  { %v368_v51 = vadd.f32 %v487_v50, %v452_v47 }
 0x19a   :  { %v438_v53 = vadd.f32 %v522_v52, %v368_v51 }
 0x19c   :  { %441 = vst [vmem:[%s812_s5] sm:$0xff] %v438_v53 }

</bundles_post_ra>
